<compile_context>
chip_gen: v5e
topology: v5e:2x2
jax: 0.10.0
libtpu: 0.0.40
codegen_flags: <defaults>
</compile_context>

<pallas_src>
import functools

import numpy as np
import jax
import jax.numpy as jnp
from jax.experimental import pallas as pl
from jax.experimental.pallas import tpu as pltpu

_LANES = 128
# 16384 rows x 128 lanes x 4 B (f32) = 8 MiB per block, 16 MiB double-buffered.
_MAX_BLOCK_ELEMS = 16384 * _LANES
_VMEM_LIMIT_BYTES = 32 * 1024 * 1024


def _colsum_kernel(x_ref, o_ref, *, tile_r, valid_rows, needs_mask):
    """Per-block column partial sums.

    x_ref : (tile_r, L) block of an (R, L) view of preds, native dtype.
    o_ref : (1, 1, L) f32 output slot owned by this grid step.
    Only the tail block (rows >= valid_rows contain DMA garbage) is masked.
    """

    def emit(x):
        o_ref[0] = jnp.sum(x, axis=0, keepdims=True)      # (1, L) f32 partial

    if needs_mask:
        i = pl.program_id(0)
        last = pl.num_programs(0) - 1

        @pl.when(i != last)
        def _fast():                                       # unmasked steady state
            emit(x_ref[...].astype(jnp.float32))

        @pl.when(i == last)
        def _tail():                                       # masked partial tail
            x = x_ref[...].astype(jnp.float32)
            row = jax.lax.broadcasted_iota(jnp.int32, x.shape, 0) + i * tile_r
            emit(jnp.where(row < valid_rows, x, 0.0))
    else:
        emit(x_ref[...].astype(jnp.float32))


def design_loss(preds, specific=None, *, max_block_elems=_MAX_BLOCK_ELEMS):
    """Pallas implementation of DesignLoss(specific).forward(preds).

    preds: (B, C) float array, DMA'd in its native dtype (bf16/f32/...).
    """
    B, C = preds.shape
    if specific is not None:
        specific = int(specific)
        if not 0 <= specific < C:
            raise ValueError(f"specific={specific} out of range for C={C}")
        if C < 2:
            raise ValueError("specific-class loss requires at least 2 classes")
    N = B * C

    # Lane-dense flat view when it is a free (order-preserving) reshape and the
    # specific column can be recovered from per-lane sums; otherwise the
    # natural (B, C) view (exact column sums, no copies, no ragged tail).
    use_flat = (C < _LANES) and (N % _LANES == 0) and (
        specific is None or _LANES % C == 0)
    if use_flat:
        L = _LANES
        x2d = preds.reshape(N // _LANES, _LANES)           # metadata-only
    else:
        L = C
        x2d = preds
    R = x2d.shape[0]

    # Block sizing: ~8 MiB of f32-equivalent per block (VMEM-padded lanes).
    lanes_padded = -(-L // _LANES) * _LANES
    rows_max = max(8, (max_block_elems // lanes_padded) // 8 * 8)
    tile_r = R if R <= rows_max else rows_max              # full dims or 8-multiple
    num_blocks = pl.cdiv(R, tile_r)
    needs_mask = (R % tile_r) != 0                         # tail block only

    kernel = functools.partial(
        _colsum_kernel, tile_r=tile_r, valid_rows=R, needs_mask=needs_mask)
    itemsize = jnp.dtype(preds.dtype).itemsize

    partials = pl.pallas_call(
        kernel,
        out_shape=jax.ShapeDtypeStruct((num_blocks, 1, L), jnp.float32),
        grid=(num_blocks,),
        in_specs=[pl.BlockSpec((tile_r, L), lambda i: (i, 0))],
        out_specs=pl.BlockSpec((1, 1, L), lambda i: (i, 0, 0)),
        compiler_params=pltpu.CompilerParams(
            dimension_semantics=("parallel",),             # no carried state
            vmem_limit_bytes=_VMEM_LIMIT_BYTES),
        cost_estimate=pl.CostEstimate(
            flops=N, transcendentals=0,
            bytes_accessed=N * itemsize + num_blocks * L * 4),
    )(x2d)

    # Tiny XLA reductions over the (num_blocks, 1, L) partials.
    col_sums = jnp.sum(partials, axis=(0, 1))              # (L,) f32
    total = jnp.sum(col_sums)

    if specific is None:
        return -total / float(N)

    if use_flat:
        # 128 % C == 0 here, so column(flat) == lane % C: a static lane mask.
        lane_is_spec = (np.arange(_LANES) % C) == specific
        spec_total = jnp.sum(jnp.where(jnp.asarray(lane_is_spec), col_sums, 0.0))
    else:
        spec_total = col_sums[specific]                    # exact column sum
    return (total - spec_total) / float((C - 1) * B) - spec_total / float(B)


def _reference(preds, specific=None):
    # pure-JAX reference mirroring the PyTorch code exactly
    if specific is None:
        return -preds.mean(axis=1).mean()
    non_specific = jnp.array([x for x in range(preds.shape[1]) if x != specific])
    return (preds[:, non_specific].mean(axis=1) - preds[:, specific]).mean()


if __name__ == "__main__":
    key = jax.random.PRNGKey(0)
    k1, k2, k3, k4 = jax.random.split(key, 4)

    # 1) (batch, num_classes) f32: lane-dense flat path (N % 128 == 0, C | 128)
    B, C = 8, 16
    preds = jax.random.normal(k1, (B, C), dtype=jnp.float32)

    out_none = jax.block_until_ready(design_loss(preds, specific=None))
    ref_none = _reference(preds, specific=None)
    assert jnp.allclose(out_none, ref_none, atol=1e-5, rtol=1e-5), (out_none, ref_none)

    out_spec = jax.block_until_ready(design_loss(preds, specific=3))
    ref_spec = _reference(preds, specific=3)
    assert jnp.allclose(out_spec, ref_spec, atol=1e-5, rtol=1e-5), (out_spec, ref_spec)

    # 2) bf16 with B*C not a multiple of 128: natural (B, C) path, native-dtype
    #    DMA, exact column sums, no pad copy.
    B2, C2 = 37, 10
    preds_bf16 = jax.random.normal(k2, (B2, C2), dtype=jnp.float32).astype(jnp.bfloat16)

    out2 = jax.block_until_ready(design_loss(preds_bf16, specific=2))
    ref2 = _reference(preds_bf16.astype(jnp.float32), specific=2)
    assert jnp.allclose(out2, ref2, atol=1e-4, rtol=1e-4), (out2, ref2)

    out2n = jax.block_until_ready(design_loss(preds_bf16, specific=None))
    ref2n = _reference(preds_bf16.astype(jnp.float32), specific=None)
    assert jnp.allclose(out2n, ref2n, atol=1e-4, rtol=1e-4), (out2n, ref2n)

    # 3) Flat path with a forced small block size: multi-step grid + masked
    #    tail block (exercises the pl.when fast/tail split).
    B3, C3 = 200, 16
    preds3 = jax.random.normal(k3, (B3, C3), dtype=jnp.float32)
    out3 = jax.block_until_ready(design_loss(preds3, specific=5, max_block_elems=1024))
    ref3 = _reference(preds3, specific=5)
    assert jnp.allclose(out3, ref3, atol=1e-4, rtol=1e-4), (out3, ref3)

    # 4) Natural path with a forced small block size: multi-step grid + masked
    #    tail block on the (B, C) view.
    B4, C4 = 50, 10
    preds4 = jax.random.normal(k4, (B4, C4), dtype=jnp.float32)
    out4 = jax.block_until_ready(design_loss(preds4, specific=7, max_block_elems=1024))
    ref4 = _reference(preds4, specific=7)
    assert jnp.allclose(out4, ref4, atol=1e-4, rtol=1e-4), (out4, ref4)

    out4n = jax.block_until_ready(design_loss(preds4, specific=None, max_block_elems=1024))
    ref4n = _reference(preds4, specific=None)
    assert jnp.allclose(out4n, ref4n, atol=1e-4, rtol=1e-4), (out4n, ref4n)

    print("KERNEL_OK")
</pallas_src>

<mosaic_0001>
module attributes {stable_mosaic.version = 11 : i64} {
  func.func @_colsum_kernel(%arg0: i32, %arg1: memref<1x128xf32, #tpu.memory_space<vmem>>, %arg2: memref<1x1x128xf32, #tpu.memory_space<vmem>>) attributes {dimension_semantics = [#tpu.dimension_semantics<parallel>], iteration_bounds = array<i64: 1>, scalar_prefetch = 0 : i64, scratch_operands = 0 : i64, tpu.core_type = #tpu.core_type<tc>, window_params = [{transform_indices = @transform_0, window_bounds = array<i64: 1, 128>}, {transform_indices = @transform_1, window_bounds = array<i64: 1, 1, 128>}]} {
    %c0 = arith.constant 0 : index
    %c0_0 = arith.constant 0 : index
    %0 = vector.load %arg1[%c0, %c0_0] : memref<1x128xf32, #tpu.memory_space<vmem>>, vector<1x128xf32>
    %cst = arith.constant dense<0.000000e+00> : vector<128xf32>
    %1 = vector.multi_reduction <add>, %0, %cst [0] : vector<1x128xf32> to vector<128xf32>
    %2 = vector.shape_cast %1 : vector<128xf32> to vector<1x128xf32>
    %c0_1 = arith.constant 0 : index
    %c0_2 = arith.constant 0 : index
    %c0_3 = arith.constant 0 : index
    %3 = vector.load %arg2[%c0_1, %c0_2, %c0_3] : memref<1x1x128xf32, #tpu.memory_space<vmem>>, vector<1x1x128xf32>
    %4 = vector.shape_cast %3 : vector<1x1x128xf32> to vector<1x128xf32>
    %5 = vector.shape_cast %2 : vector<1x128xf32> to vector<1x1x128xf32>
    tpu.vector_store %arg2[%c0_1, %c0_2, %c0_3], %5 {strides = array<i32>} : memref<1x1x128xf32, #tpu.memory_space<vmem>>, vector<1x1x128xf32>,
    return
  }
  func.func @transform_0(%arg0: i32) -> (i32, i32) {
    %c0_i32 = arith.constant 0 : i32
    %c0_i32_0 = arith.constant 0 : i32
    return %arg0, %c0_i32 : i32, i32
  }
  func.func @transform_1(%arg0: i32) -> (i32, i32, i32) {
    %c0_i32 = arith.constant 0 : i32
    %c0_i32_0 = arith.constant 0 : i32
    %c0_i32_1 = arith.constant 0 : i32
    return %arg0, %c0_i32, %c0_i32_0 : i32, i32, i32
  }
}

</mosaic_0001>

<bundles_post_ra>
// kernel: tpu_custom_call.1
= control target key start
LH: loop header
LB: loop body
LE: loop exit
PB: predicated region body
PF: predicated region fallthrough
CT: control target
= control target key end

     0   :  { %6 = vsyncpa [#allocation3], 0  ;;  %s115_s0 = inlined_call_operand.hbm [shape: f32[1,128], index: 0, kind: input, shape index: {}]   ;;  %s116_s1 = inlined_call_operand.hbm [shape: f32[1,1,128], index: 1, kind: output, shape index: {}]  }
   0x1   :  { %7 = vsyncpa [#allocation4], 0  ;;  %s13_s8 = sshll.u32 %s115_s0, 4  ;;  %s97_s9 = smov [#allocation2]   ;;  %s14_s8 = int_to_ptr.hbm [resolvable:$true] %s13_s8 }
   0x2   :  { %s15_s10 = sshll.u32 %s97_s9, 4  ;;  %s16_s10 = int_to_ptr.vmem [resolvable:$true] %s15_s10 }
   0x3   :  { %18 = dma.hbm_to_vmem [thread:$0]  %s14_s8, 16, %s16_s10, [#allocation3]  }
   0x4   :  { %93 = dma.done.wait [#allocation3], 16  }
   0x5   :  { %94 = vsyncadd [#allocation3], 4294967280  ;;  %s98_s11 = smov [#allocation5]   ;;  %s33_s15 = sshll.u32 %s116_s1, 4  ;;  %v23_v0 = vld [vmem:[#allocation2] sm:$0x1]  ;;  %s34_s15 = int_to_ptr.hbm [resolvable:$true] %s33_s15 }
   0x6   :  { %s31_s12 = sshll.u32 %s98_s11, 4  ;;  %25 = vst [vmem:[#allocation5] sm:$0x1] %v23_v0  ;;  %s32_s12 = int_to_ptr.vmem [resolvable:$true] %s31_s12 }
   0x7   :  { %36 = dma.vmem_to_hbm [thread:$0]  %s32_s12, 16, %s34_s15, [#allocation4]  }
   0x8   :  { %95 = dma.done.wait [#allocation4], 16  }
   0x9   :  { %96 = vsyncadd [#allocation4], 4294967280 }
   0xa   :  { %41 = vsyncpa [#allocation3], 1 }
   0xb   :  { %42 = vsyncpa [#allocation4], 1 }

</bundles_post_ra>
